<compile_context>
chip_gen: v6e
topology: v6e:2x2x1
jax: 0.10.0
libtpu: 0.0.40
codegen_flags: <defaults>
</compile_context>

<pallas_src>
import functools

import jax
import jax.numpy as jnp
from jax.experimental import pallas as pl
from jax.experimental.pallas import tpu as pltpu

_LANE = 128


# ----------------------------------------------------------------------------
# Kernel
# ----------------------------------------------------------------------------
def _wtf_down_kernel(x_ref, wt_ref, bt_ref, wh_ref, bh_ref, o_ref, *, c_pad):
    x = x_ref[...]                                   # (4C, tm): corners [a; b; c; d], pixels on lanes

    # Fused (detail-branch + LL-branch) matmul: X passes through the MXU once.
    y = jnp.dot(wt_ref[...], x, preferred_element_type=jnp.float32) + bt_ref[...]
    y = jnp.maximum(y, 0.0)                          # (Cp+OC, tm), f32

    yh = y[:c_pad]                                   # (Cp, tm) — rows C..Cp are exact zeros
    yl = y[c_pad:]                                   # (OC, tm)

    # outconv_bn_relu_H (tiny K=Cp; f32 operands, f32 accumulation)
    yh2 = jnp.dot(wh_ref[...], yh, preferred_element_type=jnp.float32) + bh_ref[...]
    yh2 = jnp.maximum(yh2, 0.0)                      # (OC, tm)

    # yH * sigmoid(yL)
    o_ref[...] = (yh2 * jax.nn.sigmoid(yl)).astype(o_ref.dtype)


# ----------------------------------------------------------------------------
# Tiling helpers
# ----------------------------------------------------------------------------
def _round_up(n, m):
    return ((n + m - 1) // m) * m


def _vmem_capacity_bytes():
    try:
        return int(pltpu.get_tpu_info().vmem_capacity_bytes)
    except Exception:                                 # conservative fallback = v7x per-TC VMEM
        return 64 << 20


def _choose_tile(n_lanes, row_bytes_in, row_bytes_out, vmem_cap, *, min_steps=8):
    """Pick (tm, steps): multi-MiB lane tiles sized from VMEM capacity, >= min_steps grid
    steps when N allows (v7x megacore), and at most ~one lane granule of padding per step."""
    # Single-copy (in+out) block budget ~ VMEM/16 -> double-buffered blocks use ~VMEM/8.
    block_budget = max(vmem_cap // 16, 1 << 20)
    tm_cap = max((block_budget // (row_bytes_in + row_bytes_out)) // _LANE * _LANE, _LANE)
    steps = max(min_steps, pl.cdiv(n_lanes, tm_cap))   # keep blocks under the VMEM budget
    steps = min(steps, pl.cdiv(n_lanes, _LANE))        # never create pure-padding steps
    steps = max(steps, 1)
    tm = min(_round_up(pl.cdiv(n_lanes, steps), _LANE), tm_cap)
    steps = pl.cdiv(n_lanes, tm)
    return tm, steps


# ----------------------------------------------------------------------------
# Wrapper
# ----------------------------------------------------------------------------
def wtf_down_pallas(x, params, *, compute_dtype=jnp.bfloat16, out_dtype=jnp.float32,
                    input_buffers=2, min_steps=8):
    """x: (B, C, H, W) float32 NCHW (PyTorch layout). Returns (B, out_ch, H//2, W//2)."""
    B, C, H, W = x.shape
    assert H % 2 == 0 and W % 2 == 0, "even spatial dims assumed (J=1 Haar, zero mode)"
    H2, W2 = H // 2, W // 2
    N = B * H2 * W2

    w1, b1, wl, bl, wh, bh = params                  # conv layout: (C_out, C_in) / (C_out,)
    OC = wl.shape[0]
    Cp = _round_up(C, 8)                             # sublane-aligned split point for yh / yl

    # ---- fold Haar analysis (incl. 0.5 scale) + band concat into the 1x1 conv weights ----
    # [h0; h1; h2] = (0.5*S3 kron I_C) @ [a; b; c; d],  ll = (0.5*[1,1,1,1] kron I_C) @ [a; b; c; d]
    s3 = jnp.array([[1.0,  1.0, -1.0, -1.0],
                    [1.0, -1.0,  1.0, -1.0],
                    [1.0, -1.0, -1.0,  1.0]], jnp.float32) * 0.5
    sl = jnp.full((1, 4), 0.5, jnp.float32)
    eye = jnp.eye(C, dtype=jnp.float32)
    w1_eff = w1 @ jnp.kron(s3, eye)                  # (C,  4C)
    wl_eff = wl @ jnp.kron(sl, eye)                  # (OC, 4C)

    # Single fused top weight: rows [0:C]=W1_eff, [C:Cp]=0, [Cp:Cp+OC]=WL_eff, so the yh/yl
    # slices in the kernel land on 8-row sublane-tile boundaries.
    w_top = jnp.zeros((Cp + OC, 4 * C), jnp.float32)
    w_top = w_top.at[:C].set(w1_eff).at[Cp:Cp + OC].set(wl_eff).astype(compute_dtype)
    b_top = jnp.zeros((Cp + OC, 1), jnp.float32)
    b_top = b_top.at[:C, 0].set(b1).at[Cp:Cp + OC, 0].set(bl)

    # Second-stage weight padded to Cp columns with zeros (garbage rows contribute nothing);
    # kept in f32 — K is tiny, it never touches HBM streaming.
    wh_pad = jnp.zeros((OC, Cp), jnp.float32).at[:, :C].set(wh)
    bh_c = bh.reshape(OC, 1).astype(jnp.float32)

    # ---- packed, lane-dense corner stream (4C, N): rows = [a; b; c; d], cols = output pixels.
    # Cast first so the corner-pack copy runs at compute_dtype width (bf16 halves its traffic).
    # TODO(synk): accepting/emitting NHWC or corner-major layout at the module boundary (or
    # doing the 2x2 deinterleave in-kernel with strided lane loads when W2 >= 128) would remove
    # the pack/unpack XLA transpose passes entirely for this memory-bound op.
    xc = x.astype(compute_dtype).reshape(B, C, H2, 2, W2, 2)
    xc = xc.transpose(3, 5, 1, 0, 2, 4).reshape(4 * C, N)

    # ---- tiling: VMEM-capacity-aware multi-MiB tiles, grid >= min_steps when N allows ----
    in_elt = jnp.dtype(compute_dtype).itemsize
    out_elt = jnp.dtype(out_dtype).itemsize
    vmem_cap = _vmem_capacity_bytes()
    tm, steps = _choose_tile(N, 4 * C * in_elt, OC * out_elt, vmem_cap, min_steps=min_steps)
    N_pad = steps * tm
    if N_pad != N:
        # Tail columns compute relu/sigmoid-of-bias garbage; they are sliced off below and the
        # padded buffer is never exposed to callers.
        xc = jnp.pad(xc, ((0, 0), (0, N_pad - N)))

    # ---- explicit VMEM budget: pipelined blocks + resident weights + compiler headroom ----
    in_block = 4 * C * tm * in_elt
    out_block = OC * tm * out_elt
    weight_bytes = w_top.size * in_elt + (b_top.size + wh_pad.size + bh_c.size) * 4
    vmem_limit = int(max(input_buffers, 2) * in_block + 2 * out_block
                     + 2 * weight_bytes + (16 << 20))
    vmem_limit = min(vmem_limit, vmem_cap - (2 << 20))

    if input_buffers == 2:
        x_spec = pl.BlockSpec((4 * C, tm), lambda i: (0, i))
    else:                                            # optional deeper pipelining (v7x sweep)
        x_spec = pl.BlockSpec((4 * C, tm), lambda i: (0, i),
                              pipeline_mode=pl.Buffered(input_buffers))
    full = lambda arr: pl.BlockSpec(arr.shape, lambda i: (0, 0))

    out = pl.pallas_call(
        functools.partial(_wtf_down_kernel, c_pad=Cp),
        out_shape=jax.ShapeDtypeStruct((OC, N_pad), out_dtype),
        grid_spec=pltpu.PrefetchScalarGridSpec(
            num_scalar_prefetch=0,
            grid=(steps,),
            in_specs=[x_spec, full(w_top), full(b_top), full(wh_pad), full(bh_c)],
            out_specs=pl.BlockSpec((OC, tm), lambda i: (0, i)),
        ),
        compiler_params=pltpu.CompilerParams(
            dimension_semantics=("parallel",),
            vmem_limit_bytes=vmem_limit),
    )(xc, w_top, b_top, wh_pad, bh_c)

    # Back to NCHW to match the PyTorch module's output layout.
    # Note: out_dtype below f32 would make the (OC, tm) output block sub-granule for bf16
    # sublane packing (masked stores) — keep f32 output unless the consumer needs otherwise.
    out = out[:, :N].reshape(OC, B, H2, W2).transpose(1, 0, 2, 3)
    return out


# ----------------------------------------------------------------------------
# Deterministic synthetic parameters (1x1 conv + eval-mode BatchNorm folded)
# ----------------------------------------------------------------------------
def _fold_conv_bn(w, b, gamma, beta, mean, var, eps=1e-5):
    scale = gamma / jnp.sqrt(var + eps)
    w_eff = w * scale[:, None]
    b_eff = (b - mean) * scale + beta
    return w_eff.astype(jnp.float32), b_eff.astype(jnp.float32)


def make_params(in_ch, out_ch, key):
    ks = jax.random.split(key, 6)

    def conv_bn(kw, kb, c_in, c_out, i):
        w = 0.2 * jax.random.normal(kw, (c_out, c_in), jnp.float32)
        b = 0.1 * jax.random.normal(kb, (c_out,), jnp.float32)
        gamma = 1.0 + 0.05 * jnp.arange(c_out, dtype=jnp.float32)
        beta = 0.02 * jnp.arange(c_out, dtype=jnp.float32) - 0.01 * i
        mean = 0.03 * jnp.arange(c_out, dtype=jnp.float32)
        var = 0.5 + 0.1 * jnp.arange(c_out, dtype=jnp.float32)
        return _fold_conv_bn(w, b, gamma, beta, mean, var)

    w1, b1 = conv_bn(ks[0], ks[1], 3 * in_ch, in_ch, 1)       # conv_bn_relu
    wl, bl = conv_bn(ks[2], ks[3], in_ch, out_ch, 2)          # outconv_bn_relu_L
    wh, bh = conv_bn(ks[4], ks[5], in_ch, out_ch, 3)          # outconv_bn_relu_H
    return (w1, b1, wl, bl, wh, bh)


# ----------------------------------------------------------------------------
# Pure-JAX reference (same math, no Pallas)
# ----------------------------------------------------------------------------
def wtf_down_ref(x, params):
    w1, b1, wl, bl, wh, bh = params
    a = x[:, :, 0::2, 0::2]
    b = x[:, :, 0::2, 1::2]
    c = x[:, :, 1::2, 0::2]
    d = x[:, :, 1::2, 1::2]
    ll = (a + b + c + d) * 0.5
    h0 = (a + b - c - d) * 0.5
    h1 = (a - b + c - d) * 0.5
    h2 = (a - b - c + d) * 0.5

    def conv(t, w, bb):  # (B,Ci,H,W) x (Co,Ci) -> (B,Co,H,W)
        return jnp.einsum('bchw,oc->bohw', t, w) + bb[None, :, None, None]

    yh = jnp.maximum(conv(jnp.concatenate([h0, h1, h2], axis=1), w1, b1), 0.0)
    yl = jnp.maximum(conv(ll, wl, bl), 0.0)
    yh = jnp.maximum(conv(yh, wh, bh), 0.0)
    return yh * jax.nn.sigmoid(yl)


if __name__ == "__main__":
    key = jax.random.PRNGKey(0)
    kx, kp = jax.random.split(key)

    B, C, H, W = 2, 4, 16, 16      # in_ch = 4
    out_ch = 8
    x = jax.random.normal(kx, (B, C, H, W), jnp.float32)
    params = make_params(C, out_ch, kp)

    ref = wtf_down_ref(x, params)

    # default path: bf16 activation stream, f32 accumulation / output (loose tolerance)
    fwd_bf16 = jax.jit(lambda xx: wtf_down_pallas(xx, params))
    out_bf16 = jax.block_until_ready(fwd_bf16(x))
    assert out_bf16.shape == (B, out_ch, H // 2, W // 2)
    assert jnp.allclose(out_bf16, ref, atol=5e-2, rtol=5e-2), "bf16 mismatch vs reference"

    # full f32 path (tight tolerance)
    fwd_f32 = jax.jit(lambda xx: wtf_down_pallas(xx, params, compute_dtype=jnp.float32))
    out_f32 = jax.block_until_ready(fwd_f32(x))
    assert out_f32.shape == (B, out_ch, H // 2, W // 2)
    assert jnp.allclose(out_f32, ref, atol=2e-4, rtol=2e-4), "f32 mismatch vs reference"

    print("KERNEL_OK")
</pallas_src>

<mosaic_0001>
module attributes {stable_mosaic.version = 11 : i64} {
  func.func @_wtf_down_kernel(%arg0: i32, %arg1: memref<16x128xbf16, #tpu.memory_space<vmem>>, %arg2: memref<16x16xbf16, #tpu.memory_space<vmem>>, %arg3: memref<16x1xf32, #tpu.memory_space<vmem>>, %arg4: memref<8x8xf32, #tpu.memory_space<vmem>>, %arg5: memref<8x1xf32, #tpu.memory_space<vmem>>, %arg6: memref<8x128xf32, #tpu.memory_space<vmem>>) attributes {dimension_semantics = [#tpu.dimension_semantics<parallel>], iteration_bounds = array<i64: 1>, scalar_prefetch = 0 : i64, scratch_operands = 0 : i64, tpu.core_type = #tpu.core_type<tc>, window_params = [{transform_indices = @transform_0, window_bounds = array<i64: 16, 128>}, {pipeline_mode = #tpu.pipeline_mode<synchronous>, transform_indices = @transform_1, window_bounds = array<i64: 16, 16>}, {pipeline_mode = #tpu.pipeline_mode<synchronous>, transform_indices = @transform_2, window_bounds = array<i64: 16, 1>}, {pipeline_mode = #tpu.pipeline_mode<synchronous>, transform_indices = @transform_3, window_bounds = array<i64: 8, 8>}, {pipeline_mode = #tpu.pipeline_mode<synchronous>, transform_indices = @transform_4, window_bounds = array<i64: 8, 1>}, {transform_indices = @transform_5, window_bounds = array<i64: 8, 128>}]} {
    %c0 = arith.constant 0 : index
    %c0_0 = arith.constant 0 : index
    %0 = vector.load %arg1[%c0, %c0_0] : memref<16x128xbf16, #tpu.memory_space<vmem>>, vector<16x128xbf16>
    %c0_1 = arith.constant 0 : index
    %c0_2 = arith.constant 0 : index
    %1 = vector.load %arg2[%c0_1, %c0_2] : memref<16x16xbf16, #tpu.memory_space<vmem>>, vector<16x16xbf16>
    %cst = arith.constant dense<0.000000e+00> : vector<16x128xf32>
    %2 = tpu.matmul %1, %0, %cst {dimension_numbers = #tpu.dot_dimension_numbers<[1], [0], [0], [1], [0, 0, 1, 1], [], []>} : vector<16x16xbf16>, vector<16x128xbf16>, vector<16x128xf32> -> vector<16x128xf32>
    %c0_3 = arith.constant 0 : index
    %c0_4 = arith.constant 0 : index
    %3 = vector.load %arg3[%c0_3, %c0_4] : memref<16x1xf32, #tpu.memory_space<vmem>>, vector<16x1xf32>
    %4 = vector.broadcast %3 : vector<16x1xf32> to vector<16x128xf32>
    %5 = arith.addf %2, %4 : vector<16x128xf32>
    %cst_5 = arith.constant 0.000000e+00 : f32
    %6 = vector.broadcast %cst_5 : f32 to vector<16x128xf32>
    %7 = arith.maximumf %5, %6 : vector<16x128xf32>
    %8 = vector.extract_strided_slice %7 {offsets = [0, 0], sizes = [8, 128], strides = [1, 1]} : vector<16x128xf32> to vector<8x128xf32>
    %9 = vector.extract_strided_slice %7 {offsets = [8, 0], sizes = [8, 128], strides = [1, 1]} : vector<16x128xf32> to vector<8x128xf32>
    %c0_6 = arith.constant 0 : index
    %c0_7 = arith.constant 0 : index
    %10 = vector.load %arg4[%c0_6, %c0_7] : memref<8x8xf32, #tpu.memory_space<vmem>>, vector<8x8xf32>
    %cst_8 = arith.constant dense<0.000000e+00> : vector<8x128xf32>
    %11 = tpu.matmul %10, %8, %cst_8 {dimension_numbers = #tpu.dot_dimension_numbers<[1], [0], [0], [1], [0, 0, 1, 1], [], []>} : vector<8x8xf32>, vector<8x128xf32>, vector<8x128xf32> -> vector<8x128xf32>
    %c0_9 = arith.constant 0 : index
    %c0_10 = arith.constant 0 : index
    %12 = vector.load %arg5[%c0_9, %c0_10] : memref<8x1xf32, #tpu.memory_space<vmem>>, vector<8x1xf32>
    %13 = vector.broadcast %12 : vector<8x1xf32> to vector<8x128xf32>
    %14 = arith.addf %11, %13 : vector<8x128xf32>
    %cst_11 = arith.constant 0.000000e+00 : f32
    %15 = vector.broadcast %cst_11 : f32 to vector<8x128xf32>
    %16 = arith.maximumf %14, %15 : vector<8x128xf32>
    %17 = arith.negf %9 : vector<8x128xf32>
    %18 = math.exp %17 : vector<8x128xf32>
    %cst_12 = arith.constant 1.000000e+00 : f32
    %19 = vector.broadcast %cst_12 : f32 to vector<8x128xf32>
    %20 = arith.addf %19, %18 : vector<8x128xf32>
    %21 = arith.divf %19, %20 : vector<8x128xf32>
    %22 = arith.mulf %16, %21 : vector<8x128xf32>
    %c0_13 = arith.constant 0 : index
    %c0_14 = arith.constant 0 : index
    %23 = vector.load %arg6[%c0_13, %c0_14] : memref<8x128xf32, #tpu.memory_space<vmem>>, vector<8x128xf32>
    tpu.vector_store %arg6[%c0_13, %c0_14], %22 {strides = array<i32>} : memref<8x128xf32, #tpu.memory_space<vmem>>, vector<8x128xf32>,
    return
  }
  func.func @transform_0(%arg0: i32) -> (i32, i32) {
    %c0_i32 = arith.constant 0 : i32
    %c0_i32_0 = arith.constant 0 : i32
    return %c0_i32, %arg0 : i32, i32
  }
  func.func @transform_1(%arg0: i32) -> (i32, i32) {
    %c0_i32 = arith.constant 0 : i32
    %c0_i32_0 = arith.constant 0 : i32
    %c0_i32_1 = arith.constant 0 : i32
    return %c0_i32, %c0_i32_0 : i32, i32
  }
  func.func @transform_2(%arg0: i32) -> (i32, i32) {
    %c0_i32 = arith.constant 0 : i32
    %c0_i32_0 = arith.constant 0 : i32
    %c0_i32_1 = arith.constant 0 : i32
    return %c0_i32, %c0_i32_0 : i32, i32
  }
  func.func @transform_3(%arg0: i32) -> (i32, i32) {
    %c0_i32 = arith.constant 0 : i32
    %c0_i32_0 = arith.constant 0 : i32
    %c0_i32_1 = arith.constant 0 : i32
    return %c0_i32, %c0_i32_0 : i32, i32
  }
  func.func @transform_4(%arg0: i32) -> (i32, i32) {
    %c0_i32 = arith.constant 0 : i32
    %c0_i32_0 = arith.constant 0 : i32
    %c0_i32_1 = arith.constant 0 : i32
    return %c0_i32, %c0_i32_0 : i32, i32
  }
  func.func @transform_5(%arg0: i32) -> (i32, i32) {
    %c0_i32 = arith.constant 0 : i32
    %c0_i32_0 = arith.constant 0 : i32
    return %c0_i32, %arg0 : i32, i32
  }
}

</mosaic_0001>

<bundles_post_ra>
// kernel: _lambda_.1
= control target key start
LH: loop header
LB: loop body
LE: loop exit
PB: predicated region body
PF: predicated region fallthrough
CT: control target
= control target key end

     0   :  { %v220_v0 = vmov 0.0   ;;  %vm221_vm0 = vmmov 0   ;;  %v222_v3 = vmov 0   ;;  %vm48_vm1 = vcmask 130048   ;;  %s274_s0 = inlined_call_operand.vmem [shape: bf16[16,128], index: 0, kind: input, shape index: {}]   ;;  %s275_s1 = inlined_call_operand.vmem [shape: bf16[16,16], index: 1, kind: input, shape index: {}]   ;;  %s276_s2 = inlined_call_operand.vmem [shape: f32[16,1], index: 2, kind: input, shape index: {}]   ;;  %s277_s4 = inlined_call_operand.vmem [shape: f32[8,1], index: 4, kind: input, shape index: {}]   ;;  %s278_s3 = inlined_call_operand.vmem [shape: f32[8,8], index: 3, kind: input, shape index: {}]   ;;  %s279_s5 = inlined_call_operand.vmem [shape: f32[8,128], index: 5, kind: output, shape index: {}]  }
   0x1   :  { %198 = vmatprep.subr.bf16.mxu0 %v220_v0  ;;  %v214_v1 = vld [vmem:[%s274_s0] sm:$0xff]   ;;  %200 = vmatprep.mubr.msk.bf16.mxu0 %vm221_vm0, %v220_v0  ;;  %v26_v5 = vld [vmem:[%s276_s2 + $0x8] sm:$0xff]  ;;  %vm102_vm2 = vcmask 64512  }
   0x2   :  { %v215_v2 = vld [vmem:[%s275_s1] sm:$0xff]   ;;  %212 = vset.pattern.permute.xlu0 %v222_v3  ;;  %204 = vmatprep.subr.mxu1 %v220_v0 }
   0x3   :  { %199 = vmatpush3.bf16.msra.mxu0 %v214_v1  ;;  %v25_v4 = vld [vmem:[%s276_s2] sm:$0xff]  ;;  %206 = vmatprep.mubr.msk.f32.mxu1 %vm221_vm0, %v220_v0 }
   0x4   :  { %29 = vperm.xlu0 %212, %v25_v4   ;;  %213 = vset.pattern.permute.xlu1 %v222_v3  ;;  %v96_v6 = vld [vmem:[%s277_s4] sm:$0xff] }
   0x5   :  { %99 = vperm.xlu1 %213, %v96_v6   ;;  %v95_v12 = vld [vmem:[%s278_s3] sm:$0xff] }
   0x6   :  { %201 = vmatmul.mubr.msk.bf16.vlgmr.msra.gmra.mxu0 %vm48_vm1, %v215_v2 }
   0x8   :  { %34 = vperm.xlu0 %212, %v26_v5  }
  0x7f   :  { %v30_v7 = vpop.permute.xlu0 %29 }
  0x80   :  { %v100_v21 = vpop.permute.xlu1 %99 }
  0x83   :  { %v35_v15 = vpop.permute.xlu0 %34 }
  0xc6   :  { %v86_v8 = vpop.f32.mrf.mxu0 }
  0xc7   :  { %v87_v9 = vadd.f32 %v86_v8, %v30_v7 }
  0xc8   :  { %v202_v10 = vpop.f32.mrf.mxu0 }
  0xc9   :  { %v93_v11 = vmax.f32 %v87_v9, 0.0 }
  0xca   :  { %v89_v13 = vpop.f32.mrf.mxu0 }
  0xcb   :  { %205 = vmatpush3.msra.mxu1 %v93_v11  ;;  %v90_v16 = vadd.f32 %v89_v13, %v35_v15 }
  0xcc   :  { %v203_v14 = vpop.f32.mrf.mxu0  ;;  %207 = vmatmul.mubr.msk.f32.vlgmr.msra.gmra.mxu1 %vm102_vm2, %v95_v12 }
  0xcd   :  { %v94_v17 = vmax.f32 %v90_v16, 0.0 }
  0xcf   :  { %v193_v18 = vmul.f32 -1.442695, %v94_v17 }
  0xd1   :  { %216 = vpow2.f32 %v193_v18 }
  0xde   :  { %v217_v19 = vpop.eup %216 }
  0xdf   :  { %v180_v20 = vadd.f32 1.0, %v217_v19 }
  0xe1   :  { %218 = vrcp.f32 %v180_v20 }
  0xee   :  { %v219_v26 = vpop.eup %218 }
 0x18c   :  { %v172_v22 = vpop.f32.mrf.mxu1 }
 0x18d   :  { %v173_v23 = vadd.f32 %v172_v22, %v100_v21 }
 0x18e   :  { %v208_v24 = vpop.f32.mrf.mxu1 }
 0x18f   :  { %v176_v25 = vmax.f32 %v173_v23, 0.0 }
 0x191   :  { %v183_v27 = vmul.f32 %v219_v26, %v176_v25 }
 0x193   :  { %184 = vst [vmem:[%s279_s5] sm:$0xff] %v183_v27 }

</bundles_post_ra>
